<compile_context>
chip_gen: v7x
topology: tpu7x:2x2x1
jax: 0.10.0
libtpu: 0.0.40
codegen_flags: <defaults>
</compile_context>

<pallas_src>
import jax
import jax.numpy as jnp
from jax.experimental import pallas as pl
from jax.experimental.pallas import tpu as pltpu

D_IN, D_OUT, D_HID, D_EMB, D_CLUSTERS, N_LAYERS = 4, 1, 32, 4, 4, 2
B = 8

_VMEM = pl.BlockSpec(memory_space=pltpu.MemorySpace.VMEM)
_SMEM = pl.BlockSpec(memory_space=pltpu.MemorySpace.SMEM)


def _softplus(x):
    # one exp + one log1p through the EUP; no transient inf branch
    return jnp.maximum(x, 0.0) + jnp.log1p(jnp.exp(-jnp.abs(x)))


# --------------------------------------------------------------------------
# The fused kernel.
# Inputs : bias (SMEM scalar), phi (B, d_in), pc_x (B, C),
#          w0_phi (d_in, 2H), emb0 (C, 2H) = emb @ W0_emb + b0,
#          w1 (2H, 2H) block-diag, b1 (1, 2H), w2 (2H, 2) block-diag, b2 (1, 2)
# Output : (C*B, 2) f32, col 0 = loc (final layout), col 1 = scale
# --------------------------------------------------------------------------
def _fused_kernel(bias_ref, phi_ref, pc_ref,
                  w0p_ref, emb0_ref, w1_ref, b1_ref, w2_ref, b2_ref,
                  out_ref):
    phi = phi_ref[...]                               # (B, d_in)
    pc = pc_ref[...]                                 # (B, C)
    b = phi.shape[0]
    c = pc.shape[1]
    n = c * b
    d2 = w2_ref.shape[1]                             # 2 * d_out

    # ---- merged MLPs (loc | scale share every matmul) ----------------------
    # Layer 0: phi's contribution is computed once and reused for every
    # cluster; the per-cluster embedding row (emb @ W0_emb + b0, precomputed)
    # is broadcast-added block by block -> rows k*B+b are cluster-major,
    # matching torch.cat([phi]*C, 0) + repeat_interleave of cluster ids.
    phi0 = jnp.dot(phi, w0p_ref[...], preferred_element_type=jnp.float32)   # (B, 2H)
    pre0 = jnp.concatenate(
        [phi0 + emb0_ref[k:k + 1, :] for k in range(c)], axis=0)            # (C*B, 2H)
    h = jnp.maximum(pre0, 0.0)
    h = jnp.maximum(
        jnp.dot(h, w1_ref[...], preferred_element_type=jnp.float32) + b1_ref[...],
        0.0)
    y = jnp.dot(h, w2_ref[...], preferred_element_type=jnp.float32) + b2_ref[...]  # (C*B, 2)

    # col 1 of y is the raw scale head; col 0's softplus is discarded by the
    # final lane select (free filler at this size).
    sp = _softplus(y) + 1e-10

    # ---- last-cluster loc correction ---------------------------------------
    f_x = (jnp.sum(phi, axis=-1, keepdims=True)
           + _softplus(jnp.full((b, 1), bias_ref[0], jnp.float32)))          # (B, 1)
    loc_raw = y[:, 0:1]                                                      # (C*B, 1)
    partial = jnp.zeros((b, 1), jnp.float32)
    for k in range(c - 1):            # sum_{k < C-1} loc[k*B + b] * pc_x[b, k]
        partial = partial + loc_raw[k * b:(k + 1) * b, :] * pc[:, k:k + 1]
    l_last = (f_x - partial) * pl.reciprocal(pc[:, c - 1:c], approx=False)   # (B, 1)
    l_rep = jnp.concatenate([l_last] * c, axis=0)                            # (C*B, 1)

    # ---- assemble the lane-packed output: col 0 = loc, col 1 = scale -------
    row = jax.lax.broadcasted_iota(jnp.int32, (n, d2), 0)
    col = jax.lax.broadcasted_iota(jnp.int32, (n, d2), 1)
    loc_full = jnp.where(row >= (c - 1) * b, l_rep, y)                       # (C*B, 2)
    out_ref[...] = jnp.where(col == 0, loc_full, sp)


# --------------------------------------------------------------------------
# One-time host-side parameter packing (merged slabs, folded emb contribution).
# --------------------------------------------------------------------------
def pack_params(params):
    lw0, lb0, lw1, lb1, lw2, lb2 = params['loc_net']
    sw0, sb0, sw1, sb1, sw2, sb2 = params['scale_net']
    emb = params['cluster_emb']

    w0 = jnp.concatenate([lw0, sw0], axis=1)                 # (d_in+d_emb, 2H)
    b0 = jnp.concatenate([lb0, sb0], axis=1)                 # (1, 2H)
    w0_phi = w0[:D_IN, :]                                    # (d_in, 2H)
    emb0 = emb @ w0[D_IN:, :] + b0                           # (C, 2H)

    zh = jnp.zeros((D_HID, D_HID), jnp.float32)
    w1 = jnp.concatenate([jnp.concatenate([lw1, zh], axis=1),
                          jnp.concatenate([zh, sw1], axis=1)], axis=0)   # (2H, 2H)
    b1 = jnp.concatenate([lb1, sb1], axis=1)                 # (1, 2H)

    zo = jnp.zeros((D_HID, D_OUT), jnp.float32)
    w2 = jnp.concatenate([jnp.concatenate([lw2, zo], axis=1),
                          jnp.concatenate([zo, sw2], axis=1)], axis=0)   # (2H, 2*d_out)
    b2 = jnp.concatenate([lb2, sb2], axis=1)                 # (1, 2*d_out)

    return dict(w0_phi=w0_phi, emb0=emb0, w1=w1, b1=b1, w2=w2, b2=b2)


def predictive_net_forward(params, phi, pc_x, packed=None):
    if packed is None:
        packed = pack_params(params)
    n = D_CLUSTERS * phi.shape[0]
    out = pl.pallas_call(
        _fused_kernel,
        out_shape=jax.ShapeDtypeStruct((n, 2 * D_OUT), jnp.float32),
        in_specs=[_SMEM] + [_VMEM] * 8,
        out_specs=_VMEM,
    )(params['bias'], phi, pc_x,
      packed['w0_phi'], packed['emb0'], packed['w1'], packed['b1'],
      packed['w2'], packed['b2'])
    return out[:, 0], out[:, 1]


# --------------------------------------------------------------------------
# Deterministic parameter init (synthetic, not a checkpoint load).
# --------------------------------------------------------------------------
def init_params(key):
    ks = jax.random.split(key, 4)

    def lin(k, din, dout):
        kw, kb = jax.random.split(k)
        w = jax.random.normal(kw, (din, dout), jnp.float32) / jnp.sqrt(float(din))
        b = jax.random.normal(kb, (1, dout), jnp.float32) * 0.1
        return w, b

    d_tot = D_IN + D_EMB

    def net(kbase):
        k0, k1, k2 = jax.random.split(kbase, 3)
        w0, b0 = lin(k0, d_tot, D_HID)
        w1, b1 = lin(k1, D_HID, D_HID)
        w2, b2 = lin(k2, D_HID, D_OUT)
        return (w0, b0, w1, b1, w2, b2)

    return {
        'loc_net': net(ks[0]),
        'scale_net': net(ks[1]),
        'cluster_emb': jax.random.normal(ks[2], (D_CLUSTERS, D_EMB), jnp.float32),
        'bias': jax.random.normal(ks[3], (1,), jnp.float32),
    }


# --------------------------------------------------------------------------
# Pure-JAX reference (mirrors the PyTorch forward) for the correctness check.
# --------------------------------------------------------------------------
def reference_forward(params, phi, pc_x):
    C = D_CLUSTERS
    bsz = phi.shape[0]
    emb = params['cluster_emb']
    x = jnp.concatenate([jnp.tile(phi, (C, 1)), jnp.repeat(emb, bsz, axis=0)], -1)

    def mlp(p, x):
        w0, b0, w1, b1, w2, b2 = p
        h = jax.nn.relu(x @ w0 + b0)
        h = jax.nn.relu(h @ w1 + b1)
        return h @ w2 + b2

    loc = mlp(params['loc_net'], x)[:, 0]
    scale = jax.nn.softplus(mlp(params['scale_net'], x)[:, 0]) + 1e-10
    f_x = phi.sum(-1) + jax.nn.softplus(params['bias'][0])
    loc_bd = loc.reshape(C, bsz).T
    l_last = (f_x - (loc_bd * pc_x)[:, :-1].sum(-1)) / pc_x[:, -1]
    loc_bd = loc_bd.at[:, -1].set(l_last)
    return loc_bd.T.reshape(-1), scale


if __name__ == "__main__":
    key = jax.random.PRNGKey(0)
    k_phi, k_pc, _ = jax.random.split(key, 3)

    phi = jax.random.normal(k_phi, (B, D_IN), jnp.float32)
    # pc_x: per-cluster mixture weights (strictly positive so the division is safe)
    pc_x = jax.nn.softmax(jax.random.normal(k_pc, (B, D_CLUSTERS), jnp.float32), axis=-1)

    params = init_params(jax.random.PRNGKey(42))
    packed = pack_params(params)          # one-time weight packing (prep step)

    fwd = jax.jit(predictive_net_forward)
    loc, scale = jax.block_until_ready(fwd(params, phi, pc_x, packed))

    loc_ref, scale_ref = reference_forward(params, phi, pc_x)

    assert loc.shape == (D_CLUSTERS * B,) and scale.shape == (D_CLUSTERS * B,)
    assert jnp.allclose(loc, loc_ref, rtol=1e-4, atol=1e-4)
    assert jnp.allclose(scale, scale_ref, rtol=1e-4, atol=1e-4)
    print("KERNEL_OK")
</pallas_src>

<mosaic_0001>
module attributes {stable_mosaic.version = 11 : i64} {
  func.func @_fused_kernel(%arg0: memref<1xf32, #tpu.memory_space<smem>>, %arg1: memref<8x4xf32, #tpu.memory_space<vmem>>, %arg2: memref<8x4xf32, #tpu.memory_space<vmem>>, %arg3: memref<4x64xf32, #tpu.memory_space<vmem>>, %arg4: memref<4x64xf32, #tpu.memory_space<vmem>>, %arg5: memref<64x64xf32, #tpu.memory_space<vmem>>, %arg6: memref<1x64xf32, #tpu.memory_space<vmem>>, %arg7: memref<64x2xf32, #tpu.memory_space<vmem>>, %arg8: memref<1x2xf32, #tpu.memory_space<vmem>>, %arg9: memref<32x2xf32, #tpu.memory_space<vmem>>) attributes {dimension_semantics = [], scalar_prefetch = 0 : i64, scratch_operands = 0 : i64, tpu.core_type = #tpu.core_type<tc>} {
    %c0 = arith.constant 0 : index
    %c0_0 = arith.constant 0 : index
    %0 = vector.load %arg1[%c0, %c0_0] : memref<8x4xf32, #tpu.memory_space<vmem>>, vector<8x4xf32>
    %c0_1 = arith.constant 0 : index
    %c0_2 = arith.constant 0 : index
    %1 = vector.load %arg2[%c0_1, %c0_2] : memref<8x4xf32, #tpu.memory_space<vmem>>, vector<8x4xf32>
    %c0_3 = arith.constant 0 : index
    %c0_4 = arith.constant 0 : index
    %2 = vector.load %arg3[%c0_3, %c0_4] : memref<4x64xf32, #tpu.memory_space<vmem>>, vector<4x64xf32>
    %cst = arith.constant dense<0.000000e+00> : vector<8x64xf32>
    %3 = tpu.matmul %0, %2, %cst {dimension_numbers = #tpu.dot_dimension_numbers<[1], [0], [0], [1], [0, 0, 1, 1], [], []>} : vector<8x4xf32>, vector<4x64xf32>, vector<8x64xf32> -> vector<8x64xf32>
    %c0_5 = arith.constant 0 : index
    %c0_6 = arith.constant 0 : index
    %4 = vector.load %arg4[%c0_5, %c0_6] : memref<4x64xf32, #tpu.memory_space<vmem>>, vector<1x64xf32>
    %5 = vector.broadcast %4 : vector<1x64xf32> to vector<8x64xf32>
    %6 = arith.addf %3, %5 : vector<8x64xf32>
    %c1 = arith.constant 1 : index
    %c0_7 = arith.constant 0 : index
    %7 = vector.load %arg4[%c1, %c0_7] : memref<4x64xf32, #tpu.memory_space<vmem>>, vector<1x64xf32>
    %8 = vector.broadcast %7 : vector<1x64xf32> to vector<8x64xf32>
    %9 = arith.addf %3, %8 : vector<8x64xf32>
    %c2 = arith.constant 2 : index
    %c0_8 = arith.constant 0 : index
    %10 = vector.load %arg4[%c2, %c0_8] : memref<4x64xf32, #tpu.memory_space<vmem>>, vector<1x64xf32>
    %11 = vector.broadcast %10 : vector<1x64xf32> to vector<8x64xf32>
    %12 = arith.addf %3, %11 : vector<8x64xf32>
    %c3 = arith.constant 3 : index
    %c0_9 = arith.constant 0 : index
    %13 = vector.load %arg4[%c3, %c0_9] : memref<4x64xf32, #tpu.memory_space<vmem>>, vector<1x64xf32>
    %14 = vector.broadcast %13 : vector<1x64xf32> to vector<8x64xf32>
    %15 = arith.addf %3, %14 : vector<8x64xf32>
    %16 = tpu.concatenate %6, %9, %12, %15 in 0 : vector<8x64xf32>, vector<8x64xf32>, vector<8x64xf32>, vector<8x64xf32> -> vector<32x64xf32>
    %cst_10 = arith.constant 0.000000e+00 : f32
    %17 = vector.broadcast %cst_10 : f32 to vector<32x64xf32>
    %18 = arith.maximumf %16, %17 : vector<32x64xf32>
    %c0_11 = arith.constant 0 : index
    %c0_12 = arith.constant 0 : index
    %19 = vector.load %arg5[%c0_11, %c0_12] : memref<64x64xf32, #tpu.memory_space<vmem>>, vector<64x64xf32>
    %cst_13 = arith.constant dense<0.000000e+00> : vector<32x64xf32>
    %20 = tpu.matmul %18, %19, %cst_13 {dimension_numbers = #tpu.dot_dimension_numbers<[1], [0], [0], [1], [0, 0, 1, 1], [], []>} : vector<32x64xf32>, vector<64x64xf32>, vector<32x64xf32> -> vector<32x64xf32>
    %c0_14 = arith.constant 0 : index
    %c0_15 = arith.constant 0 : index
    %21 = vector.load %arg6[%c0_14, %c0_15] : memref<1x64xf32, #tpu.memory_space<vmem>>, vector<1x64xf32>
    %22 = vector.broadcast %21 : vector<1x64xf32> to vector<32x64xf32>
    %23 = arith.addf %20, %22 : vector<32x64xf32>
    %cst_16 = arith.constant 0.000000e+00 : f32
    %24 = vector.broadcast %cst_16 : f32 to vector<32x64xf32>
    %25 = arith.maximumf %23, %24 : vector<32x64xf32>
    %c0_17 = arith.constant 0 : index
    %c0_18 = arith.constant 0 : index
    %26 = vector.load %arg7[%c0_17, %c0_18] : memref<64x2xf32, #tpu.memory_space<vmem>>, vector<64x2xf32>
    %cst_19 = arith.constant dense<0.000000e+00> : vector<32x2xf32>
    %27 = tpu.matmul %25, %26, %cst_19 {dimension_numbers = #tpu.dot_dimension_numbers<[1], [0], [0], [1], [0, 0, 1, 1], [], []>} : vector<32x64xf32>, vector<64x2xf32>, vector<32x2xf32> -> vector<32x2xf32>
    %c0_20 = arith.constant 0 : index
    %c0_21 = arith.constant 0 : index
    %28 = vector.load %arg8[%c0_20, %c0_21] : memref<1x2xf32, #tpu.memory_space<vmem>>, vector<1x2xf32>
    %29 = vector.broadcast %28 : vector<1x2xf32> to vector<32x2xf32>
    %30 = arith.addf %27, %29 : vector<32x2xf32>
    %cst_22 = arith.constant 0.000000e+00 : f32
    %31 = vector.broadcast %cst_22 : f32 to vector<32x2xf32>
    %32 = arith.maximumf %30, %31 : vector<32x2xf32>
    %33 = math.absf %30 : vector<32x2xf32>
    %cst_23 = arith.constant 0.000000e+00 : f32
    %34 = vector.broadcast %cst_23 : f32 to vector<32x2xf32>
    %35 = arith.subf %34, %33 : vector<32x2xf32>
    %36 = math.exp %35 : vector<32x2xf32>
    %37 = math.log1p %36 : vector<32x2xf32>
    %38 = arith.addf %32, %37 : vector<32x2xf32>
    %cst_24 = arith.constant 1.000000e-10 : f32
    %39 = vector.broadcast %cst_24 : f32 to vector<32x2xf32>
    %40 = arith.addf %38, %39 : vector<32x2xf32>
    %cst_25 = arith.constant dense<0.000000e+00> : vector<8xf32>
    %41 = vector.multi_reduction <add>, %0, %cst_25 [1] : vector<8x4xf32> to vector<8xf32>
    %42 = vector.shape_cast %41 : vector<8xf32> to vector<8x1xf32>
    %c0_26 = arith.constant 0 : index
    %43 = memref.load %arg0[%c0_26] : memref<1xf32, #tpu.memory_space<smem>>
    %44 = vector.broadcast %43 : f32 to vector<8x1xf32>
    %cst_27 = arith.constant 0.000000e+00 : f32
    %45 = vector.broadcast %cst_27 : f32 to vector<8x1xf32>
    %46 = arith.maximumf %44, %45 : vector<8x1xf32>
    %47 = math.absf %44 : vector<8x1xf32>
    %cst_28 = arith.constant 0.000000e+00 : f32
    %48 = vector.broadcast %cst_28 : f32 to vector<8x1xf32>
    %49 = arith.subf %48, %47 : vector<8x1xf32>
    %50 = math.exp %49 : vector<8x1xf32>
    %51 = math.log1p %50 : vector<8x1xf32>
    %52 = arith.addf %46, %51 : vector<8x1xf32>
    %53 = arith.addf %42, %52 : vector<8x1xf32>
    %54 = vector.extract_strided_slice %30 {offsets = [0, 0], sizes = [32, 1], strides = [1, 1]} : vector<32x2xf32> to vector<32x1xf32>
    %cst_29 = arith.constant 0.000000e+00 : f32
    %55 = vector.broadcast %cst_29 : f32 to vector<8x1xf32>
    %56 = vector.extract_strided_slice %54 {offsets = [0, 0], sizes = [8, 1], strides = [1, 1]} : vector<32x1xf32> to vector<8x1xf32>
    %57 = vector.extract_strided_slice %1 {offsets = [0, 0], sizes = [8, 1], strides = [1, 1]} : vector<8x4xf32> to vector<8x1xf32>
    %58 = arith.mulf %56, %57 : vector<8x1xf32>
    %59 = arith.addf %55, %58 : vector<8x1xf32>
    %60 = vector.extract_strided_slice %54 {offsets = [8, 0], sizes = [8, 1], strides = [1, 1]} : vector<32x1xf32> to vector<8x1xf32>
    %61 = vector.extract_strided_slice %1 {offsets = [0, 1], sizes = [8, 1], strides = [1, 1]} : vector<8x4xf32> to vector<8x1xf32>
    %62 = arith.mulf %60, %61 : vector<8x1xf32>
    %63 = arith.addf %59, %62 : vector<8x1xf32>
    %64 = vector.extract_strided_slice %54 {offsets = [16, 0], sizes = [8, 1], strides = [1, 1]} : vector<32x1xf32> to vector<8x1xf32>
    %65 = vector.extract_strided_slice %1 {offsets = [0, 2], sizes = [8, 1], strides = [1, 1]} : vector<8x4xf32> to vector<8x1xf32>
    %66 = arith.mulf %64, %65 : vector<8x1xf32>
    %67 = arith.addf %63, %66 : vector<8x1xf32>
    %68 = arith.subf %53, %67 : vector<8x1xf32>
    %69 = vector.extract_strided_slice %1 {offsets = [0, 3], sizes = [8, 1], strides = [1, 1]} : vector<8x4xf32> to vector<8x1xf32>
    %70 = tpu.reciprocal %69 : vector<8x1xf32> -> vector<8x1xf32>
    %71 = arith.mulf %68, %70 : vector<8x1xf32>
    %72 = tpu.concatenate %71, %71, %71, %71 in 0 : vector<8x1xf32>, vector<8x1xf32>, vector<8x1xf32>, vector<8x1xf32> -> vector<32x1xf32>
    %73 = tpu.iota {dimensions = array<i32: 0>} : vector<32x2xi32>
    %74 = tpu.iota {dimensions = array<i32: 1>} : vector<32x2xi32>
    %c24_i32 = arith.constant 24 : i32
    %75 = vector.broadcast %c24_i32 : i32 to vector<32x2xi32>
    %76 = arith.cmpi sge, %73, %75 : vector<32x2xi32>
    %77 = vector.shape_cast %72 : vector<32x1xf32> to vector<32x1xf32>
    %78 = vector.broadcast %77 : vector<32x1xf32> to vector<32x2xf32>
    %79 = arith.select %76, %78, %30 : vector<32x2xi1>, vector<32x2xf32>
    %c0_i32 = arith.constant 0 : i32
    %80 = vector.broadcast %c0_i32 : i32 to vector<32x2xi32>
    %81 = arith.cmpi eq, %74, %80 : vector<32x2xi32>
    %82 = arith.select %81, %79, %40 : vector<32x2xi1>, vector<32x2xf32>
    %c0_30 = arith.constant 0 : index
    %c0_31 = arith.constant 0 : index
    %83 = vector.load %arg9[%c0_30, %c0_31] : memref<32x2xf32, #tpu.memory_space<vmem>>, vector<32x2xf32>
    tpu.vector_store %arg9[%c0_30, %c0_31], %82 {strides = array<i32>} : memref<32x2xf32, #tpu.memory_space<vmem>>, vector<32x2xf32>,
    return
  }
}

</mosaic_0001>

<bundles_post_ra>
// kernel: predictive_net_forward.1
= control target key start
LH: loop header
LB: loop body
LE: loop exit
PB: predicated region body
PF: predicated region fallthrough
CT: control target
= control target key end

     0   :  { %vm40_vm0 = vcmask 1043456   ;;  %vm36_vm1 = vcmask 31744   ;;  %v663_v0 = vmov 0.0   ;;  %vm664_vm2 = vmmov 0   ;;  %s665_s28 = smov 126   ;;  %s666_s29 = smov 125   ;;  %s859_s3 = inlined_call_operand.vmem [shape: f32[4,64], index: 3, kind: input, shape index: {}]   ;;  %s860_s1 = inlined_call_operand.vmem [shape: f32[8,4], index: 1, kind: input, shape index: {}]   ;;  %s861_s5 = inlined_call_operand.vmem [shape: f32[64,64], index: 5, kind: input, shape index: {}]   ;;  %s862_s7 = inlined_call_operand.vmem [shape: f32[64,2], index: 7, kind: input, shape index: {}]   ;;  %s863_s4 = inlined_call_operand.vmem [shape: f32[4,64], index: 4, kind: input, shape index: {}]   ;;  %s864_s2 = inlined_call_operand.vmem [shape: f32[8,4], index: 2, kind: input, shape index: {}]   ;;  %s865_s6 = inlined_call_operand.vmem [shape: f32[1,64], index: 6, kind: input, shape index: {}]   ;;  %s866_s0 = inlined_call_operand.<no memory space> [shape: f32[1], index: 0, kind: input, shape index: {}]   ;;  %s867_s8 = inlined_call_operand.vmem [shape: f32[1,2], index: 8, kind: input, shape index: {}]   ;;  %s868_s9 = inlined_call_operand.vmem [shape: f32[32,2], index: 9, kind: output, shape index: {}]  }
   0x1   :  { %552 = vmatprep.subr.mxu0 %v663_v0  ;;  %v35_v1 = vld [vmem:[%s859_s3] sm:$0xf]  ;;  %554 = vmatprep.mubr.msk.f32.mxu0 %vm664_vm2, %v663_v0  ;;  %v143_v4 = vld [vmem:[%s861_s5 + $0x8] sm:$0xff]  ;;  %v144_v5 = vld [vmem:[%s861_s5 + $0x10] sm:$0xff]  ;;  %vm157_vm3 = vcmask 523264   ;;  %s667_s30 = smov 127   ;;  %v439_v58 = vstv %s866_s0 }
   0x2   :  { %v725_v2 = vld [vmem:[%s860_s1] sm:$0xff]  ;;  %553 = vmatpush3.msk.msra.mxu0 %vm40_vm0, %v35_v1  ;;  %v145_v6 = vld [vmem:[%s861_s5 + $0x18] sm:$0xff]  ;;  %v147_v10 = vld [vmem:[%s861_s5 + $0x28] sm:$0xff]  ;;  %v668_v57 = vmov 0   ;;  %v441_v59 = vand.u32 2147483647, %v439_v58 }
   0x3   :  { %v142_v3 = vld [vmem:[%s861_s5] sm:$0xff]  ;;  %555 = vmatmul.mubr.msk.f32.vlgmr.msra.gmra.mrb[0].mxu0 %vm36_vm1, %v725_v2  ;;  %v605_v8 = vpack.c.bf16 %v145_v6, %v144_v5  ;;  %v148_v12 = vld [vmem:[%s861_s5 + $0x30] sm:$0xff]  ;;  %v149_v13 = vld [vmem:[%s861_s5 + $0x38] sm:$0xff]  ;;  %v435_v41 = vsel %vm36_vm1, %v725_v2, 0.0  ;;  %639 = vset.pattern.permute.xlu1 %v668_v57  ;;  %vm501_vm8 = vcmask 15360  }
   0x4   :  { %v601_v7 = vpack.c.bf16 %v143_v4, %v142_v3  ;;  %v146_v9 = vld [vmem:[%s861_s5 + $0x20] sm:$0xff]  ;;  %v613_v14 = vpack.c.bf16 %v149_v13, %v148_v12  ;;  %v260_v16 = vld [vmem:[%s862_s7 + $0x8] sm:$0xff]  ;;  %v261_v17 = vld [vmem:[%s862_s7 + $0x10] sm:$0xff]  ;;  %436 = vadd.xlane.f32.xlu0 %v435_v41  ;;  %v442_v60 = vsub.f32 0.0, %v441_v59  ;;  %v440_v13 = vmax.f32 %v439_v58, 0.0 }
   0x5   :  { %v609_v11 = vpack.c.bf16 %v147_v10, %v146_v9  ;;  %v259_v15 = vld [vmem:[%s862_s7] sm:$0xff]  ;;  %v262_v19 = vld [vmem:[%s862_s7 + $0x18] sm:$0xff]  ;;  %v264_v22 = vld [vmem:[%s862_s7 + $0x28] sm:$0xff]  ;;  %640 = vset.pattern.permute.xlu0 %v668_v57 }
   0x6   :  { %602 = vmatprep.subr.bf16.mxu1 %v601_v7  ;;  %v617_v18 = vpack.c.bf16 %v260_v16, %v259_v15  ;;  %v621_v20 = vpack.c.bf16 %v262_v19, %v261_v17  ;;  %v263_v21 = vld [vmem:[%s862_s7 + $0x20] sm:$0xff]  ;;  %v265_v38 = vld [vmem:[%s862_s7 + $0x30] sm:$0xff]  ;;  %v266_v39 = vld [vmem:[%s862_s7 + $0x38] sm:$0xff]  ;;  %v443_v61 = vmul.f32 1.442695, %v442_v60 }
   0x7   :  { %604 = vmatpush3.bf16.msra.mxu1 %v601_v7  ;;  %v625_v23 = vpack.c.bf16 %v264_v22, %v263_v21  ;;  %v513_v24 = vld [vmem:[%s863_s4 + $0x1] ss:$0 sm:$0xff]  ;;  %v514_v25 = vld [vmem:[%s863_s4 + $0x2] ss:$0 sm:$0xff]  ;;  %v512_v26 = vld [vmem:[%s863_s4] ss:$0 sm:$0xff]  ;;  %v629_v40 = vpack.c.bf16 %v266_v39, %v265_v38 }
   0x8   :  { %606 = vmatprep.subr.bf16.mxu1 %v605_v8  ;;  %618 = vmatprep.subr.bf16.mxu0 %v617_v18  ;;  %v515_v30 = vld [vmem:[%s863_s4 + $0x3] ss:$0 sm:$0xff]  ;;  %v516_v44 = vld [vmem:[%s865_s6] ss:$0 sm:$0xff] }
   0x9   :  { %620 = vmatpush3.bf16.msra.mxu0 %v617_v18  ;;  %v34_v42 = vld [vmem:[%s864_s2] sm:$0xff] }
   0xa   :  { %622 = vmatprep.subr.bf16.mxu0 %v621_v20  ;;  %641 = vrcp.f32 %v34_v42  ;;  %464 = vrot.lane.b32.xlu1 %v34_v42, %s665_s28  ;;  %v521_v5 = vld [vmem:[%s867_s8] ss:$0 sm:$0xff] }
   0xb   :  { %608 = vmatpush3.bf16.msra.mxu1 %v605_v8  ;;  %643 = vpow2.f32 %v443_v61 }
   0xc   :  { %610 = vmatprep.subr.bf16.mxu1 %v609_v11 }
   0xd   :  { %624 = vmatpush3.bf16.msra.mxu0 %v621_v20 }
   0xe   :  { %626 = vmatprep.subr.bf16.mxu0 %v625_v23 }
   0xf   :  { %612 = vmatpush3.bf16.msra.mxu1 %v609_v11 }
  0x10   :  { %614 = vmatprep.subr.bf16.mxu1 %v613_v14 }
  0x11   :  { %628 = vmatpush3.bf16.msra.mxu0 %v625_v23 }
  0x12   :  { %630 = vmatprep.subr.bf16.mxu0 %v629_v40 }
  0x13   :  { %616 = vmatpush3.bf16.msra.mxu1 %v613_v14 }
  0x14   :  { %v642_v43 = vpop.eup %641 }
  0x15   :  { %632 = vmatpush3.bf16.msra.mxu0 %v629_v40  ;;  %472 = vrot.lane.b32.xlu1 %v642_v43, %s666_s29  ;;  %v644_v62 = vpop.eup %643 }
  0x16   :  { %v445_v63 = vadd.f32 1.0, %v644_v62  ;;  %v448_v0 = vmul.f32 -0.5, %v644_v62  ;;  %v451_v4 = vand.u32 2147483647, %v644_v62 }
  0x18   :  { %645 = vlog2.f32 %v445_v63  ;;  %v449_v2 = vadd.f32 1.0, %v448_v0  ;;  %vm811_vm4 = vcmp.lt.f32.partialorder %v451_v4, 0.0004427343 }
  0x1a   :  { %459 = vrot.lane.b32.xlu0 %v34_v42, %s667_s30  ;;  %v450_v7 = vmul.f32 %v644_v62, %v449_v2 }
  0x22   :  { %v646_v3 = vpop.eup %645 }
  0x23   :  { %v447_v6 = vmul.f32 0.6931472, %v646_v3 }
  0x25   :  { %v453_v15 = vsel %vm811_vm4, %v450_v7, %v447_v6 }
  0x91   :  { %v437_v1 = vpop.xlane.xlu0 %436 }
  0x95   :  { %v460_v10 = vpop.permute.xlu0 %459 }
  0xd6   :  { %v110_v27 = vpop.f32.mrb[0].mxu0 }
  0xd7   :  { %v125_v28 = vadd.f32 %v513_v24, %v110_v27  ;;  %v131_v29 = vadd.f32 %v514_v25, %v110_v27  ;;  %v556_v31 = vpop.f32.mrb[1].mxu0  ;;  %v119_v32 = vadd.f32 %v512_v26, %v110_v27  ;;  %v137_v35 = vadd.f32 %v515_v30, %v110_v27  ;;  %v465_v24 = vpop.permute.xlu1 %464 }
  0xd8   :  { %v454_v25 = vadd.f32 %v453_v15, %v440_v13 }
  0xd9   :  { %v139_v33 = vmax.f32 %v125_v28, 0.0  ;;  %v138_v34 = vmax.f32 %v119_v32, 0.0  ;;  %v140_v36 = vmax.f32 %v131_v29, 0.0  ;;  %v141_v37 = vmax.f32 %v137_v35, 0.0 }
  0xdb   :  { %573 = vmatprep.mubr.msk.f32.mxu1 %vm157_vm3, %v138_v34 }
  0xdc   :  { %574 = vmatmul.mubr.msk.f32.vlgmr.msra.gmra.mrb[0].mxu1 %vm157_vm3, %v139_v33  ;;  %v455_v33 = vadd.f32 %v454_v25, %v437_v1 }
  0xdd   :  { %576 = vmatprep.mubr.msk.f32.mxu1 %vm157_vm3, %v140_v36  ;;  %v473_v36 = vpop.permute.xlu1 %472 }
  0xe0   :  { %577 = vmatmul.mubr.msk.f32.gmra.mrb[2].mxu1 %vm157_vm3, %v141_v37 }
 0x1af   :  { %v575_v45 = vpop.f32.mrb[0].mxu1 }
 0x1b0   :  { %v242_v46 = vadd.f32 %v575_v45, %v516_v44  ;;  %v236_v47 = vpop.f32.mrb[1].mxu1 }
 0x1b1   :  { %v237_v48 = vadd.f32 %v516_v44, %v236_v47 }
 0x1b2   :  { %v256_v51 = vmax.f32 %v242_v46, 0.0 }
 0x1b3   :  { %v255_v49 = vmax.f32 %v237_v48, 0.0  ;;  %v578_v50 = vpop.f32.mrb[2].mxu1 }
 0x1b4   :  { %v252_v52 = vadd.f32 %v578_v50, %v516_v44  ;;  %v246_v53 = vpop.f32.mrb[3].mxu1 }
 0x1b5   :  { %v247_v54 = vadd.f32 %v516_v44, %v246_v53  ;;  %595 = vmatprep.mubr.msk.f32.mxu0 %vm157_vm3, %v255_v49  ;;  %v481_v49 = vlaneseq }
 0x1b6   :  { %596 = vmatmul.mubr.msk.f32.vlgmr.msra.gmra.mrb[2].mxu0 %vm157_vm3, %v256_v51  ;;  %v258_v56 = vmax.f32 %v252_v52, 0.0 }
 0x1b7   :  { %v257_v55 = vmax.f32 %v247_v54, 0.0  ;;  %v482_v59 = vand.u32 127, %v481_v49 }
 0x1b9   :  { %598 = vmatprep.mubr.msk.f32.mxu0 %vm157_vm3, %v257_v55  ;;  %vm496_vm7 = vcmp.eq.s32.totalorder %v482_v59, 0 }
 0x1ba   :  { %599 = vmatmul.mubr.msk.f32.gmra.mrb[4].mxu0 %vm157_vm3, %v258_v56 }
 0x289   :  { %v597_v9 = vpop.f32.mrb[2].mxu0 }
 0x28a   :  { %v815_v11 = vadd.f32 %v597_v9, %v521_v5  ;;  %v352_v12 = vpop.f32.mrb[3].mxu0 }
 0x28b   :  { %v817_v14 = vadd.f32 %v521_v5, %v352_v12 }
 0x28c   :  { %v376_v16 = vand.u32 2147483647, %v815_v11  ;;  %v462_v17 = vmul.f32 %v460_v10, %v815_v11  ;;  %v372_v56 = vmax.f32 %v815_v11, 0.0 }
 0x28d   :  { %v375_v18 = vand.u32 2147483647, %v817_v14  ;;  %v456_v19 = vmul.f32 %v817_v14, %v34_v42  ;;  %v600_v20 = vpop.f32.mrb[4].mxu0  ;;  %v371_v0 = vmax.f32 %v817_v14, 0.0 }
 0x28e   :  { %v380_v21 = vsub.f32 0.0, %v376_v16  ;;  %v825_v22 = vadd.f32 %v600_v20, %v521_v5  ;;  %v362_v23 = vpop.f32.mrb[5].mxu0 }
 0x28f   :  { %v379_v26 = vsub.f32 0.0, %v375_v18  ;;  %v463_v27 = vadd.f32 %v462_v17, %v456_v19  ;;  %v827_v28 = vadd.f32 %v521_v5, %v362_v23 }
 0x290   :  { %v385_v29 = vmul.f32 1.442695, %v380_v21 }
 0x291   :  { %v383_v30 = vmul.f32 1.442695, %v379_v26  ;;  %v377_v31 = vand.u32 2147483647, %v827_v28  ;;  %v467_v32 = vmul.f32 %v465_v24, %v827_v28  ;;  %v373_v10 = vmax.f32 %v827_v28, 0.0 }
 0x292   :  { %647 = vpow2.f32 %v385_v29 }
 0x293   :  { %649 = vpow2.f32 %v383_v30  ;;  %v381_v34 = vsub.f32 0.0, %v377_v31  ;;  %v468_v35 = vadd.f32 %v467_v32, %v463_v27  ;;  %v374_v30 = vmax.f32 %v825_v22, 0.0 }
 0x295   :  { %v387_v37 = vmul.f32 1.442695, %v381_v34  ;;  %v469_v38 = vsub.f32 %v455_v33, %v468_v35 }
 0x297   :  { %651 = vpow2.f32 %v387_v37  ;;  %v475_v39 = vmul.f32 %v473_v36, %v469_v38 }
 0x299   :  { %489 = vperm.xlu1 %639, %v475_v39  }
 0x29c   :  { %v648_v40 = vpop.eup %647 }
 0x29d   :  { %v650_v41 = vpop.eup %649  ;;  %v400_v42 = vadd.f32 1.0, %v648_v40  ;;  %v403_v45 = vmul.f32 -0.5, %v648_v40  ;;  %v406_v50 = vand.u32 2147483647, %v648_v40 }
 0x29e   :  { %v391_v43 = vadd.f32 1.0, %v650_v41  ;;  %v394_v47 = vmul.f32 -0.5, %v650_v41  ;;  %v397_v53 = vand.u32 2147483647, %v650_v41 }
 0x29f   :  { %653 = vlog2.f32 %v400_v42  ;;  %v404_v48 = vadd.f32 1.0, %v403_v45  ;;  %vm407_vm5 = vcmp.lt.f32.partialorder %v406_v50, 0.0004427343 }
 0x2a0   :  { %655 = vlog2.f32 %v391_v43  ;;  %v395_v51 = vadd.f32 1.0, %v394_v47  ;;  %vm398_vm6 = vcmp.lt.f32.partialorder %v397_v53, 0.0004427343 }
 0x2a1   :  { %v652_v44 = vpop.eup %651  ;;  %v405_v58 = vmul.f32 %v648_v40, %v404_v48 }
 0x2a2   :  { %v409_v46 = vadd.f32 1.0, %v652_v44  ;;  %v412_v52 = vmul.f32 -0.5, %v652_v44  ;;  %v396_v61 = vmul.f32 %v650_v41, %v395_v51  ;;  %v415_v1 = vand.u32 2147483647, %v652_v44 }
 0x2a4   :  { %657 = vlog2.f32 %v409_v46  ;;  %v413_v62 = vadd.f32 1.0, %v412_v52  ;;  %vm416_vm9 = vcmp.lt.f32.partialorder %v415_v1, 0.0004427343 }
 0x2a6   :  { %v414_v8 = vmul.f32 %v652_v44, %v413_v62 }
 0x2a9   :  { %v654_v54 = vpop.eup %653 }
 0x2aa   :  { %v656_v55 = vpop.eup %655  ;;  %v402_v57 = vmul.f32 0.6931472, %v654_v54 }
 0x2ab   :  { %v393_v60 = vmul.f32 0.6931472, %v656_v55 }
 0x2ac   :  { %v408_v63 = vsel %vm407_vm5, %v405_v58, %v402_v57 }
 0x2ad   :  { %v428_v2 = vadd.f32 %v408_v63, %v372_v56  ;;  %v399_v3 = vsel %vm398_vm6, %v396_v61, %v393_v60 }
 0x2ae   :  { %v658_v4 = vpop.eup %657  ;;  %v427_v5 = vadd.f32 %v399_v3, %v371_v0 }
 0x2af   :  { %v432_v6 = vadd.f32 1e-10, %v428_v2  ;;  %v411_v7 = vmul.f32 0.6931472, %v658_v4 }
 0x2b0   :  { %v431_v9 = vadd.f32 1e-10, %v427_v5 }
 0x2b1   :  { %v417_v12 = vsel %vm416_vm9, %v414_v8, %v411_v7  ;;  %v498_v13 = vsel %vm496_vm7, %v815_v11, %v432_v6  ;;  %v378_v11 = vand.u32 2147483647, %v825_v22 }
 0x2b2   :  { %v429_v15 = vadd.f32 %v417_v12, %v373_v10  ;;  %v497_v16 = vsel %vm496_vm7, %v817_v14, %v431_v9  ;;  %503 = vst.msk [vmem:[%s868_s9 + $0x8] sm:$0xff] %vm501_vm8, %v498_v13 }
 0x2b3   :  { %502 = vst.msk [vmem:[%s868_s9] sm:$0xff] %vm501_vm8, %v497_v16  ;;  %v382_v14 = vsub.f32 0.0, %v378_v11 }
 0x2b4   :  { %v433_v17 = vadd.f32 1e-10, %v429_v15 }
 0x2b5   :  { %v389_v19 = vmul.f32 1.442695, %v382_v14 }
 0x2b6   :  { %v499_v18 = vsel %vm496_vm7, %v827_v28, %v433_v17 }
 0x2b7   :  { %504 = vst.msk [vmem:[%s868_s9 + $0x10] sm:$0xff] %vm501_vm8, %v499_v18  ;;  %659 = vpow2.f32 %v389_v19 }
 0x2c1   :  { %v660_v20 = vpop.eup %659 }
 0x2c2   :  { %v418_v21 = vadd.f32 1.0, %v660_v20  ;;  %v421_v23 = vmul.f32 -0.5, %v660_v20  ;;  %v424_v26 = vand.u32 2147483647, %v660_v20 }
 0x2c4   :  { %661 = vlog2.f32 %v418_v21  ;;  %v422_v25 = vadd.f32 1.0, %v421_v23  ;;  %vm425_vm10 = vcmp.lt.f32.partialorder %v424_v26, 0.0004427343 }
 0x2c6   :  { %v423_v29 = vmul.f32 %v660_v20, %v422_v25 }
 0x2ce   :  { %v662_v24 = vpop.eup %661 }
 0x2cf   :  { %v420_v27 = vmul.f32 0.6931472, %v662_v24 }
 0x2d1   :  { %v426_v28 = vsel %vm425_vm10, %v423_v29, %v420_v27 }
 0x2d2   :  { %v430_v31 = vadd.f32 %v426_v28, %v374_v30 }
 0x2d4   :  { %v434_v32 = vadd.f32 1e-10, %v430_v31 }
 0x318   :  { %v490_v33 = vpop.permute.xlu1 %489 }
 0x319   :  { %v500_v34 = vsel %vm496_vm7, %v490_v33, %v434_v32 }
 0x31a   :  { %505 = vst.msk [vmem:[%s868_s9 + $0x18] sm:$0xff] %vm501_vm8, %v500_v34 }

</bundles_post_ra>
